<compile_context>
chip_gen: v7x
topology: tpu7x:2x2x1
jax: 0.10.0
libtpu: 0.0.40
codegen_flags: <defaults>
</compile_context>

<pallas_src>
import numpy as np
import jax
import jax.numpy as jnp
from jax.experimental import pallas as pl
from jax.experimental.pallas import tpu as pltpu


def _dice_kernel(mgt_ref, cls_ref, sup_ref, tgt_ref, stgt_ref,
                 fcs_ref, oh_ref,
                 inter_c_ref, sum_c_ref, cnt_c_ref,
                 inter_s_ref, sum_s_ref, cnt_s_ref):
    C, TN = cls_ref.shape
    S = sup_ref.shape[0]

    cls = cls_ref[...]                                    # [C, TN] f32
    sup = sup_ref[...]                                    # [S, TN] f32
    tgt = tgt_ref[...]                                    # [1, TN] i32
    stgt = stgt_ref[...]                                  # [1, TN] i32

    # Target one-hot over the class axis (torch scatter_ equivalent).
    class_ids = jax.lax.broadcasted_iota(jnp.int32, (C, TN), 0)
    onehot = (class_ids == tgt).astype(jnp.float32)       # [C, TN]
    oh_ref[...] = onehot

    # Super-target one-hot: compare against precomputed super labels.
    super_ids = jax.lax.broadcasted_iota(jnp.int32, (S, TN), 0)
    sup_onehot = (super_ids == stgt).astype(jnp.float32)  # [S, TN]

    # final_class_score[c] = class_score[c] * superclass_scores[super(c)]
    # (zero row in mgt for classes not listed in super2sub).  One-hot row
    # gather on the MXU; HIGHEST precision keeps the f32 values exact.
    gathered_sup = jnp.dot(mgt_ref[...], sup,
                           preferred_element_type=jnp.float32,
                           precision=jax.lax.Precision.HIGHEST)  # [C, TN]
    fcs_ref[...] = cls * gathered_sup

    # Per-tile DICE partial sums; finished in plain JAX outside the kernel.
    inter_c_ref[...] = jnp.sum(cls * onehot, axis=1, keepdims=True)      # [C,1]
    sum_c_ref[...] = jnp.sum(cls, axis=1, keepdims=True)                 # [C,1]
    cnt_c_ref[...] = jnp.sum(onehot, axis=1, keepdims=True)              # [C,1]
    inter_s_ref[...] = jnp.sum(sup * sup_onehot, axis=1, keepdims=True)  # [S,1]
    sum_s_ref[...] = jnp.sum(sup, axis=1, keepdims=True)                 # [S,1]
    cnt_s_ref[...] = jnp.sum(sup_onehot, axis=1, keepdims=True)          # [S,1]


def _pick_tile(hw, cap):
    """Largest multiple of 128 that divides hw and is <= cap; else hw itself."""
    best = None
    d = 128
    while d <= min(hw, cap):
        if hw % d == 0:
            best = d
        d += 128
    return best if best is not None else hw


def super_label_dice_loss(superclass_scores, class_score, super2sub, target,
                          weights, _lambda=0.1, tile_cap=16384):
    B, C, H, W = class_score.shape
    S = superclass_scores.shape[1]
    HW = H * W
    TN = _pick_tile(HW, tile_cap)
    T = HW // TN

    # Pure reshapes (no transposes): channel-major within each batch element.
    cls3 = class_score.reshape(B, C, HW).astype(jnp.float32)
    sup3 = superclass_scores.reshape(B, S, HW).astype(jnp.float32)
    tgt3 = target.reshape(B, 1, HW).astype(jnp.int32)

    # Static class->superclass tables (mirrors the python loops over super2sub,
    # including torch's "last assignment wins" / "unlisted class -> super 0"
    # semantics for super_target and "unlisted class -> zero row" for the
    # final_class_score gather).
    sub2super = np.zeros(C, dtype=np.int32)
    listed = np.zeros(C, dtype=bool)
    for i, subs in enumerate(super2sub):
        for j in subs:
            sub2super[j] = i
            listed[j] = True
    m_gather_t = np.zeros((C, S), np.float32)
    for c in range(C):
        if listed[c]:
            m_gather_t[c, sub2super[c]] = 1.0

    # Trivial int gather in the wrapper: per-pixel super label stream.
    stgt3 = jnp.asarray(sub2super)[target].reshape(B, 1, HW).astype(jnp.int32)

    sq = pl.Squeezed()
    big_spec_c = pl.BlockSpec((sq, C, TN), lambda b, t: (b, 0, t))
    big_spec_s = pl.BlockSpec((sq, S, TN), lambda b, t: (b, 0, t))
    lbl_spec = pl.BlockSpec((sq, 1, TN), lambda b, t: (b, 0, t))
    part_c = pl.BlockSpec((sq, sq, C, 1), lambda b, t: (b, t, 0, 0))
    part_s = pl.BlockSpec((sq, sq, S, 1), lambda b, t: (b, t, 0, 0))

    out_shape = (
        jax.ShapeDtypeStruct((B, C, HW), jnp.float32),    # final_class_score
        jax.ShapeDtypeStruct((B, C, HW), jnp.float32),    # target_one_hot
        jax.ShapeDtypeStruct((B, T, C, 1), jnp.float32),  # inter_c partials
        jax.ShapeDtypeStruct((B, T, C, 1), jnp.float32),  # sum(cls) partials
        jax.ShapeDtypeStruct((B, T, C, 1), jnp.float32),  # sum(onehot) partials
        jax.ShapeDtypeStruct((B, T, S, 1), jnp.float32),  # inter_s partials
        jax.ShapeDtypeStruct((B, T, S, 1), jnp.float32),  # sum(sup) partials
        jax.ShapeDtypeStruct((B, T, S, 1), jnp.float32),  # sum(sup onehot)
    )

    outs = pl.pallas_call(
        _dice_kernel,
        out_shape=out_shape,
        grid=(B, T),
        in_specs=[
            pl.BlockSpec((C, S), lambda b, t: (0, 0)),    # gather matrix
            big_spec_c,                                   # class scores
            big_spec_s,                                   # superclass scores
            lbl_spec,                                     # target labels
            lbl_spec,                                     # super-target labels
        ],
        out_specs=(big_spec_c, big_spec_c,
                   part_c, part_c, part_c,
                   part_s, part_s, part_s),
        compiler_params=pltpu.CompilerParams(
            dimension_semantics=("parallel", "parallel"),
            vmem_limit_bytes=32 * 1024 * 1024),
    )(jnp.asarray(m_gather_t), cls3, sup3, tgt3, stgt3)

    fcs3, oh3, p_ic, p_sc, p_cc, p_is, p_ss, p_cs = outs

    # Scalar finish in plain JAX (O(C+S) work).
    smooth = 1e-07
    w = jnp.asarray(weights, jnp.float32).reshape(C)

    inter_c = p_ic.sum(axis=(0, 1)).reshape(C)
    isum_c = p_sc.sum(axis=(0, 1)).reshape(C)
    tsum_c = p_cc.sum(axis=(0, 1)).reshape(C)
    dice_c = 1.0 - (2.0 * inter_c + smooth) / (isum_c + tsum_c + smooth)
    final_class_loss = jnp.sum(dice_c * w)

    inter_s = p_is.sum(axis=(0, 1)).reshape(S)
    isum_s = p_ss.sum(axis=(0, 1)).reshape(S)
    tsum_s = p_cs.sum(axis=(0, 1)).reshape(S)
    dice_s = 1.0 - (2.0 * inter_s + smooth) / (isum_s + tsum_s + smooth)
    super_class_loss = jnp.sum(dice_s)

    loss = _lambda * super_class_loss / S + final_class_loss / jnp.sum(w)

    final_class_score = fcs3.reshape(B, C, H, W)
    target_one_hot = oh3.reshape(B, C, H, W)
    return loss, final_class_score, target_one_hot


def _reference_forward(superclass_scores, class_score, super2sub, target,
                       weights, lam):
    """Pure-JAX mirror of the PyTorch forward, for validation."""
    B, C, H, W = class_score.shape
    S = len(super2sub)
    sub2super = np.zeros(C, dtype=np.int32)
    for i, subs in enumerate(super2sub):
        for j in subs:
            sub2super[j] = i
    super_target = jnp.asarray(sub2super)[target]
    t1h = jnp.transpose(jax.nn.one_hot(target, C, dtype=jnp.float32), (0, 3, 1, 2))
    st1h = jnp.transpose(jax.nn.one_hot(super_target, C, dtype=jnp.float32), (0, 3, 1, 2))
    smooth = 1e-07
    super_loss = 0.0
    for cl in range(S):
        ifl = superclass_scores[:, cl].reshape(-1)
        tfl = st1h[:, cl].reshape(-1)
        inter = jnp.sum(ifl * tfl)
        super_loss += 1.0 - (2.0 * inter + smooth) / (jnp.sum(ifl) + jnp.sum(tfl) + smooth)
    final_loss = 0.0
    for cl in range(C):
        ifl = class_score[:, cl].reshape(-1)
        tfl = t1h[:, cl].reshape(-1)
        inter = jnp.sum(ifl * tfl)
        final_loss += (1.0 - (2.0 * inter + smooth) /
                       (jnp.sum(ifl) + jnp.sum(tfl) + smooth)) * weights[cl]
    loss = lam * super_loss / S + final_loss / jnp.sum(weights)
    fcs = jnp.zeros_like(class_score)
    for i, subs in enumerate(super2sub):
        for j in subs:
            fcs = fcs.at[:, j].set(class_score[:, j] * superclass_scores[:, i])
    return loss, fcs, t1h


if __name__ == "__main__":
    B, C, H, W = 2, 8, 16, 16
    super2sub = [[0, 1, 2], [3, 4], [5, 6, 7]]
    S = len(super2sub)

    key = jax.random.PRNGKey(0)
    k1, k2, k3 = jax.random.split(key, 3)
    class_score = jax.random.uniform(k1, (B, C, H, W), jnp.float32)
    superclass_scores = jax.random.uniform(k2, (B, S, H, W), jnp.float32)
    target = jax.random.randint(k3, (B, H, W), 0, C, jnp.int32)
    weights = jnp.arange(1, C + 1, dtype=jnp.float32)
    lam = 0.1

    # tile_cap=128 forces TN=128 -> 2 pixel tiles per batch element, so the
    # multi-tile path (partial-sum reassembly) is exercised at this small size.
    loss, final_class_score, target_one_hot = jax.block_until_ready(
        super_label_dice_loss(superclass_scores, class_score, super2sub,
                              target, weights, _lambda=lam, tile_cap=128))

    ref_loss, ref_fcs, ref_oh = _reference_forward(
        superclass_scores, class_score, super2sub, target, weights, lam)

    np.testing.assert_allclose(np.asarray(loss), np.asarray(ref_loss),
                               rtol=1e-4, atol=1e-6)
    np.testing.assert_allclose(np.asarray(final_class_score), np.asarray(ref_fcs),
                               rtol=1e-5, atol=1e-6)
    np.testing.assert_allclose(np.asarray(target_one_hot), np.asarray(ref_oh),
                               rtol=0, atol=1e-6)

    print("KERNEL_OK")
</pallas_src>

<mosaic_0001>
module attributes {stable_mosaic.version = 11 : i64} {
  func.func @_dice_kernel(%arg0: i32, %arg1: i32, %arg2: memref<8x3xf32, #tpu.memory_space<vmem>>, %arg3: memref<1x8x128xf32, #tpu.memory_space<vmem>>, %arg4: memref<1x3x128xf32, #tpu.memory_space<vmem>>, %arg5: memref<1x1x128xi32, #tpu.memory_space<vmem>>, %arg6: memref<1x1x128xi32, #tpu.memory_space<vmem>>, %arg7: memref<1x8x128xf32, #tpu.memory_space<vmem>>, %arg8: memref<1x8x128xf32, #tpu.memory_space<vmem>>, %arg9: memref<1x1x8x1xf32, #tpu.memory_space<vmem>>, %arg10: memref<1x1x8x1xf32, #tpu.memory_space<vmem>>, %arg11: memref<1x1x8x1xf32, #tpu.memory_space<vmem>>, %arg12: memref<1x1x3x1xf32, #tpu.memory_space<vmem>>, %arg13: memref<1x1x3x1xf32, #tpu.memory_space<vmem>>, %arg14: memref<1x1x3x1xf32, #tpu.memory_space<vmem>>) attributes {dimension_semantics = [#tpu.dimension_semantics<parallel>, #tpu.dimension_semantics<parallel>], iteration_bounds = array<i64: 2, 2>, scalar_prefetch = 0 : i64, scratch_operands = 0 : i64, tpu.core_type = #tpu.core_type<tc>, window_params = [{pipeline_mode = #tpu.pipeline_mode<synchronous>, transform_indices = @transform_0, window_bounds = array<i64: 8, 3>}, {transform_indices = @transform_1, window_bounds = array<i64: 1, 8, 128>}, {transform_indices = @transform_2, window_bounds = array<i64: 1, 3, 128>}, {transform_indices = @transform_3, window_bounds = array<i64: 1, 1, 128>}, {transform_indices = @transform_4, window_bounds = array<i64: 1, 1, 128>}, {transform_indices = @transform_5, window_bounds = array<i64: 1, 8, 128>}, {transform_indices = @transform_6, window_bounds = array<i64: 1, 8, 128>}, {transform_indices = @transform_7, window_bounds = array<i64: 1, 1, 8, 1>}, {transform_indices = @transform_8, window_bounds = array<i64: 1, 1, 8, 1>}, {transform_indices = @transform_9, window_bounds = array<i64: 1, 1, 8, 1>}, {transform_indices = @transform_10, window_bounds = array<i64: 1, 1, 3, 1>}, {transform_indices = @transform_11, window_bounds = array<i64: 1, 1, 3, 1>}, {transform_indices = @transform_12, window_bounds = array<i64: 1, 1, 3, 1>}]} {
    %c0 = arith.constant 0 : index
    %c0_0 = arith.constant 0 : index
    %c0_1 = arith.constant 0 : index
    %0 = vector.load %arg3[%c0, %c0_0, %c0_1] : memref<1x8x128xf32, #tpu.memory_space<vmem>>, vector<1x8x128xf32>
    %1 = vector.shape_cast %0 : vector<1x8x128xf32> to vector<8x128xf32>
    %c0_2 = arith.constant 0 : index
    %c0_3 = arith.constant 0 : index
    %c0_4 = arith.constant 0 : index
    %2 = vector.load %arg4[%c0_2, %c0_3, %c0_4] : memref<1x3x128xf32, #tpu.memory_space<vmem>>, vector<1x3x128xf32>
    %3 = vector.shape_cast %2 : vector<1x3x128xf32> to vector<3x128xf32>
    %c0_5 = arith.constant 0 : index
    %c0_6 = arith.constant 0 : index
    %c0_7 = arith.constant 0 : index
    %4 = vector.load %arg5[%c0_5, %c0_6, %c0_7] : memref<1x1x128xi32, #tpu.memory_space<vmem>>, vector<1x1x128xi32>
    %5 = vector.shape_cast %4 : vector<1x1x128xi32> to vector<1x128xi32>
    %c0_8 = arith.constant 0 : index
    %c0_9 = arith.constant 0 : index
    %c0_10 = arith.constant 0 : index
    %6 = vector.load %arg6[%c0_8, %c0_9, %c0_10] : memref<1x1x128xi32, #tpu.memory_space<vmem>>, vector<1x1x128xi32>
    %7 = vector.shape_cast %6 : vector<1x1x128xi32> to vector<1x128xi32>
    %8 = tpu.iota {dimensions = array<i32: 0>} : vector<8x128xi32>
    %9 = vector.broadcast %5 : vector<1x128xi32> to vector<8x128xi32>
    %10 = arith.cmpi eq, %8, %9 : vector<8x128xi32>
    %11 = arith.extui %10 : vector<8x128xi1> to vector<8x128xi32>
    %12 = arith.sitofp %11 : vector<8x128xi32> to vector<8x128xf32>
    %c0_11 = arith.constant 0 : index
    %c0_12 = arith.constant 0 : index
    %c0_13 = arith.constant 0 : index
    %13 = vector.load %arg8[%c0_11, %c0_12, %c0_13] : memref<1x8x128xf32, #tpu.memory_space<vmem>>, vector<1x8x128xf32>
    %14 = vector.shape_cast %13 : vector<1x8x128xf32> to vector<8x128xf32>
    %15 = vector.shape_cast %12 : vector<8x128xf32> to vector<1x8x128xf32>
    tpu.vector_store %arg8[%c0_11, %c0_12, %c0_13], %15 {strides = array<i32>} : memref<1x8x128xf32, #tpu.memory_space<vmem>>, vector<1x8x128xf32>,
    %16 = tpu.iota {dimensions = array<i32: 0>} : vector<3x128xi32>
    %17 = vector.broadcast %7 : vector<1x128xi32> to vector<3x128xi32>
    %18 = arith.cmpi eq, %16, %17 : vector<3x128xi32>
    %19 = arith.extui %18 : vector<3x128xi1> to vector<3x128xi32>
    %20 = arith.sitofp %19 : vector<3x128xi32> to vector<3x128xf32>
    %c0_14 = arith.constant 0 : index
    %c0_15 = arith.constant 0 : index
    %21 = vector.load %arg2[%c0_14, %c0_15] : memref<8x3xf32, #tpu.memory_space<vmem>>, vector<8x3xf32>
    %cst = arith.constant dense<0.000000e+00> : vector<8x128xf32>
    %22 = tpu.matmul %21, %3, %cst {dimension_numbers = #tpu.dot_dimension_numbers<[1], [0], [0], [1], [0, 0, 1, 1], [], []>, precision = #tpu.contract_precision<fp32>} : vector<8x3xf32>, vector<3x128xf32>, vector<8x128xf32> -> vector<8x128xf32>
    %23 = arith.mulf %1, %22 : vector<8x128xf32>
    %c0_16 = arith.constant 0 : index
    %c0_17 = arith.constant 0 : index
    %c0_18 = arith.constant 0 : index
    %24 = vector.load %arg7[%c0_16, %c0_17, %c0_18] : memref<1x8x128xf32, #tpu.memory_space<vmem>>, vector<1x8x128xf32>
    %25 = vector.shape_cast %24 : vector<1x8x128xf32> to vector<8x128xf32>
    %26 = vector.shape_cast %23 : vector<8x128xf32> to vector<1x8x128xf32>
    tpu.vector_store %arg7[%c0_16, %c0_17, %c0_18], %26 {strides = array<i32>} : memref<1x8x128xf32, #tpu.memory_space<vmem>>, vector<1x8x128xf32>,
    %27 = arith.mulf %1, %12 : vector<8x128xf32>
    %cst_19 = arith.constant dense<0.000000e+00> : vector<8xf32>
    %28 = vector.multi_reduction <add>, %27, %cst_19 [1] : vector<8x128xf32> to vector<8xf32>
    %29 = vector.shape_cast %28 : vector<8xf32> to vector<8x1xf32>
    %c0_20 = arith.constant 0 : index
    %c0_21 = arith.constant 0 : index
    %c0_22 = arith.constant 0 : index
    %c0_23 = arith.constant 0 : index
    %30 = vector.load %arg9[%c0_20, %c0_21, %c0_22, %c0_23] : memref<1x1x8x1xf32, #tpu.memory_space<vmem>>, vector<1x1x8x1xf32>
    %31 = vector.shape_cast %30 : vector<1x1x8x1xf32> to vector<8x1xf32>
    %32 = vector.shape_cast %29 : vector<8x1xf32> to vector<1x1x8x1xf32>
    tpu.vector_store %arg9[%c0_20, %c0_21, %c0_22, %c0_23], %32 {strides = array<i32>} : memref<1x1x8x1xf32, #tpu.memory_space<vmem>>, vector<1x1x8x1xf32>,
    %cst_24 = arith.constant dense<0.000000e+00> : vector<8xf32>
    %33 = vector.multi_reduction <add>, %1, %cst_24 [1] : vector<8x128xf32> to vector<8xf32>
    %34 = vector.shape_cast %33 : vector<8xf32> to vector<8x1xf32>
    %c0_25 = arith.constant 0 : index
    %c0_26 = arith.constant 0 : index
    %c0_27 = arith.constant 0 : index
    %c0_28 = arith.constant 0 : index
    %35 = vector.load %arg10[%c0_25, %c0_26, %c0_27, %c0_28] : memref<1x1x8x1xf32, #tpu.memory_space<vmem>>, vector<1x1x8x1xf32>
    %36 = vector.shape_cast %35 : vector<1x1x8x1xf32> to vector<8x1xf32>
    %37 = vector.shape_cast %34 : vector<8x1xf32> to vector<1x1x8x1xf32>
    tpu.vector_store %arg10[%c0_25, %c0_26, %c0_27, %c0_28], %37 {strides = array<i32>} : memref<1x1x8x1xf32, #tpu.memory_space<vmem>>, vector<1x1x8x1xf32>,
    %cst_29 = arith.constant dense<0.000000e+00> : vector<8xf32>
    %38 = vector.multi_reduction <add>, %12, %cst_29 [1] : vector<8x128xf32> to vector<8xf32>
    %39 = vector.shape_cast %38 : vector<8xf32> to vector<8x1xf32>
    %c0_30 = arith.constant 0 : index
    %c0_31 = arith.constant 0 : index
    %c0_32 = arith.constant 0 : index
    %c0_33 = arith.constant 0 : index
    %40 = vector.load %arg11[%c0_30, %c0_31, %c0_32, %c0_33] : memref<1x1x8x1xf32, #tpu.memory_space<vmem>>, vector<1x1x8x1xf32>
    %41 = vector.shape_cast %40 : vector<1x1x8x1xf32> to vector<8x1xf32>
    %42 = vector.shape_cast %39 : vector<8x1xf32> to vector<1x1x8x1xf32>
    tpu.vector_store %arg11[%c0_30, %c0_31, %c0_32, %c0_33], %42 {strides = array<i32>} : memref<1x1x8x1xf32, #tpu.memory_space<vmem>>, vector<1x1x8x1xf32>,
    %43 = arith.mulf %3, %20 : vector<3x128xf32>
    %cst_34 = arith.constant dense<0.000000e+00> : vector<3xf32>
    %44 = vector.multi_reduction <add>, %43, %cst_34 [1] : vector<3x128xf32> to vector<3xf32>
    %45 = vector.shape_cast %44 : vector<3xf32> to vector<3x1xf32>
    %c0_35 = arith.constant 0 : index
    %c0_36 = arith.constant 0 : index
    %c0_37 = arith.constant 0 : index
    %c0_38 = arith.constant 0 : index
    %46 = vector.load %arg12[%c0_35, %c0_36, %c0_37, %c0_38] : memref<1x1x3x1xf32, #tpu.memory_space<vmem>>, vector<1x1x3x1xf32>
    %47 = vector.shape_cast %46 : vector<1x1x3x1xf32> to vector<3x1xf32>
    %48 = vector.shape_cast %45 : vector<3x1xf32> to vector<1x1x3x1xf32>
    tpu.vector_store %arg12[%c0_35, %c0_36, %c0_37, %c0_38], %48 {strides = array<i32>} : memref<1x1x3x1xf32, #tpu.memory_space<vmem>>, vector<1x1x3x1xf32>,
    %cst_39 = arith.constant dense<0.000000e+00> : vector<3xf32>
    %49 = vector.multi_reduction <add>, %3, %cst_39 [1] : vector<3x128xf32> to vector<3xf32>
    %50 = vector.shape_cast %49 : vector<3xf32> to vector<3x1xf32>
    %c0_40 = arith.constant 0 : index
    %c0_41 = arith.constant 0 : index
    %c0_42 = arith.constant 0 : index
    %c0_43 = arith.constant 0 : index
    %51 = vector.load %arg13[%c0_40, %c0_41, %c0_42, %c0_43] : memref<1x1x3x1xf32, #tpu.memory_space<vmem>>, vector<1x1x3x1xf32>
    %52 = vector.shape_cast %51 : vector<1x1x3x1xf32> to vector<3x1xf32>
    %53 = vector.shape_cast %50 : vector<3x1xf32> to vector<1x1x3x1xf32>
    tpu.vector_store %arg13[%c0_40, %c0_41, %c0_42, %c0_43], %53 {strides = array<i32>} : memref<1x1x3x1xf32, #tpu.memory_space<vmem>>, vector<1x1x3x1xf32>,
    %cst_44 = arith.constant dense<0.000000e+00> : vector<3xf32>
    %54 = vector.multi_reduction <add>, %20, %cst_44 [1] : vector<3x128xf32> to vector<3xf32>
    %55 = vector.shape_cast %54 : vector<3xf32> to vector<3x1xf32>
    %c0_45 = arith.constant 0 : index
    %c0_46 = arith.constant 0 : index
    %c0_47 = arith.constant 0 : index
    %c0_48 = arith.constant 0 : index
    %56 = vector.load %arg14[%c0_45, %c0_46, %c0_47, %c0_48] : memref<1x1x3x1xf32, #tpu.memory_space<vmem>>, vector<1x1x3x1xf32>
    %57 = vector.shape_cast %56 : vector<1x1x3x1xf32> to vector<3x1xf32>
    %58 = vector.shape_cast %55 : vector<3x1xf32> to vector<1x1x3x1xf32>
    tpu.vector_store %arg14[%c0_45, %c0_46, %c0_47, %c0_48], %58 {strides = array<i32>} : memref<1x1x3x1xf32, #tpu.memory_space<vmem>>, vector<1x1x3x1xf32>,
    return
  }
  func.func @transform_0(%arg0: i32, %arg1: i32) -> (i32, i32) {
    %c0_i32 = arith.constant 0 : i32
    %c0_i32_0 = arith.constant 0 : i32
    %c0_i32_1 = arith.constant 0 : i32
    return %c0_i32, %c0_i32_0 : i32, i32
  }
  func.func @transform_1(%arg0: i32, %arg1: i32) -> (i32, i32, i32) {
    %c0_i32 = arith.constant 0 : i32
    %c0_i32_0 = arith.constant 0 : i32
    return %arg0, %c0_i32, %arg1 : i32, i32, i32
  }
  func.func @transform_2(%arg0: i32, %arg1: i32) -> (i32, i32, i32) {
    %c0_i32 = arith.constant 0 : i32
    %c0_i32_0 = arith.constant 0 : i32
    return %arg0, %c0_i32, %arg1 : i32, i32, i32
  }
  func.func @transform_3(%arg0: i32, %arg1: i32) -> (i32, i32, i32) {
    %c0_i32 = arith.constant 0 : i32
    %c0_i32_0 = arith.constant 0 : i32
    return %arg0, %c0_i32, %arg1 : i32, i32, i32
  }
  func.func @transform_4(%arg0: i32, %arg1: i32) -> (i32, i32, i32) {
    %c0_i32 = arith.constant 0 : i32
    %c0_i32_0 = arith.constant 0 : i32
    return %arg0, %c0_i32, %arg1 : i32, i32, i32
  }
  func.func @transform_5(%arg0: i32, %arg1: i32) -> (i32, i32, i32) {
    %c0_i32 = arith.constant 0 : i32
    %c0_i32_0 = arith.constant 0 : i32
    return %arg0, %c0_i32, %arg1 : i32, i32, i32
  }
  func.func @transform_6(%arg0: i32, %arg1: i32) -> (i32, i32, i32) {
    %c0_i32 = arith.constant 0 : i32
    %c0_i32_0 = arith.constant 0 : i32
    return %arg0, %c0_i32, %arg1 : i32, i32, i32
  }
  func.func @transform_7(%arg0: i32, %arg1: i32) -> (i32, i32, i32, i32) {
    %c0_i32 = arith.constant 0 : i32
    %c0_i32_0 = arith.constant 0 : i32
    %c0_i32_1 = arith.constant 0 : i32
    return %arg0, %arg1, %c0_i32, %c0_i32_0 : i32, i32, i32, i32
  }
  func.func @transform_8(%arg0: i32, %arg1: i32) -> (i32, i32, i32, i32) {
    %c0_i32 = arith.constant 0 : i32
    %c0_i32_0 = arith.constant 0 : i32
    %c0_i32_1 = arith.constant 0 : i32
    return %arg0, %arg1, %c0_i32, %c0_i32_0 : i32, i32, i32, i32
  }
  func.func @transform_9(%arg0: i32, %arg1: i32) -> (i32, i32, i32, i32) {
    %c0_i32 = arith.constant 0 : i32
    %c0_i32_0 = arith.constant 0 : i32
    %c0_i32_1 = arith.constant 0 : i32
    return %arg0, %arg1, %c0_i32, %c0_i32_0 : i32, i32, i32, i32
  }
  func.func @transform_10(%arg0: i32, %arg1: i32) -> (i32, i32, i32, i32) {
    %c0_i32 = arith.constant 0 : i32
    %c0_i32_0 = arith.constant 0 : i32
    %c0_i32_1 = arith.constant 0 : i32
    return %arg0, %arg1, %c0_i32, %c0_i32_0 : i32, i32, i32, i32
  }
  func.func @transform_11(%arg0: i32, %arg1: i32) -> (i32, i32, i32, i32) {
    %c0_i32 = arith.constant 0 : i32
    %c0_i32_0 = arith.constant 0 : i32
    %c0_i32_1 = arith.constant 0 : i32
    return %arg0, %arg1, %c0_i32, %c0_i32_0 : i32, i32, i32, i32
  }
  func.func @transform_12(%arg0: i32, %arg1: i32) -> (i32, i32, i32, i32) {
    %c0_i32 = arith.constant 0 : i32
    %c0_i32_0 = arith.constant 0 : i32
    %c0_i32_1 = arith.constant 0 : i32
    return %arg0, %arg1, %c0_i32, %c0_i32_0 : i32, i32, i32, i32
  }
}

</mosaic_0001>

<bundles_post_ra>
// kernel: tpu_custom_call.1
= control target key start
LH: loop header
LB: loop body
LE: loop exit
PB: predicated region body
PF: predicated region fallthrough
CT: control target
= control target key end

     0   :  { %s2247_s0 = inlined_call_operand.vmem [shape: f32[8,3], index: 0, kind: input, shape index: {}]   ;;  %s2248_s1 = inlined_call_operand.vmem [shape: f32[2,8,256], index: 1, kind: input, shape index: {}]   ;;  %s2249_s2 = inlined_call_operand.vmem [shape: f32[2,3,256], index: 2, kind: input, shape index: {}]   ;;  %s2250_s3 = inlined_call_operand.vmem [shape: s32[2,1,256], index: 3, kind: input, shape index: {}]   ;;  %s2251_s4 = inlined_call_operand.vmem [shape: s32[2,1,256], index: 4, kind: input, shape index: {}]   ;;  %s2252_s5 = inlined_call_operand.hbm [shape: f32[2,8,256], index: 5, kind: output, shape index: {0}]   ;;  %s2253_s6 = inlined_call_operand.hbm [shape: f32[2,8,256], index: 6, kind: output, shape index: {1}]   ;;  %s2254_s7 = inlined_call_operand.vmem [shape: f32[2,2,8,1], index: 7, kind: output, shape index: {2}]   ;;  %s2255_s8 = inlined_call_operand.vmem [shape: f32[2,2,8,1], index: 8, kind: output, shape index: {3}]   ;;  %s2256_s9 = inlined_call_operand.vmem [shape: f32[2,2,8,1], index: 9, kind: output, shape index: {4}]   ;;  %s2257_s10 = inlined_call_operand.vmem [shape: f32[2,2,3,1], index: 10, kind: output, shape index: {5}]   ;;  %s2258_s11 = inlined_call_operand.vmem [shape: f32[2,2,3,1], index: 11, kind: output, shape index: {6}]   ;;  %s2259_s12 = inlined_call_operand.vmem [shape: f32[2,2,3,1], index: 12, kind: output, shape index: {7}]  }
   0x1   :  { %2269 = sst [smem:[#allocation16_spill]] %s2247_s0 }
   0x2   :  { %18 = vsyncpa [#allocation3], 0 }
   0x3   :  { %20 = vsyncpa [#allocation3 + $0x1], 0 }
   0x4   :  { %21 = vsyncpa [#allocation5], 0 }
   0x5   :  { %23 = vsyncpa [#allocation5 + $0x1], 0  ;;  %s2001_s21 = smov 0   ;;  %s2003_s22 = smov 0  }
   0x6   :  { %s2005_s23 = smov 0   ;;  %s2007_s24 = smov 0  }
   0x7   :  { %s2009_s25 = smov 0   ;;  %s2011_s26 = smov 0  }
   0x8   :  { %s2013_s27 = smov 0   ;;  %s2015_s28 = smov 0  }
   0x9 LB: > { %2270 = sst [smem:[#allocation8_spill]] %s1902_s21  ;;  %s1638_s29 = sadd.s32 4294967295, %s1930_s28   ;;  %s1930_s28 = sphi %s2015_s28, %s29_s28   ;;  %s1926_s27 = sphi %s2013_s27, %s2290_s27   ;;  %s1922_s26 = sphi %s2011_s26, %s2289_s26   ;;  %s1918_s25 = sphi %s2009_s25, %s2288_s25   ;;  %s1914_s24 = sphi %s2007_s24, %s2287_s24   ;;  %s1910_s23 = sphi %s2005_s23, %s2286_s23   ;;  %s1906_s22 = sphi %s2003_s22, %s2292_s22   ;;  %s1902_s21 = sphi %s2001_s21, %s2291_s21  }
   0xa   : > { %2271 = sst [smem:[#allocation9_spill]] %s1910_s23  ;;  %s1639_s30 = sadd.s32 4294967294, %s1930_s28  }
   0xb   : > { %2272 = sst [smem:[#allocation10_spill]] %s1922_s26  ;;  %s38_s13 = sadd.s32 1, %s1922_s26 }
   0xc   : > { %2273 = sst [smem:[#allocation11_spill]] %s1926_s27  ;;  %p39_p0 = scmp.ge.s32.totalorder %s38_s13, 2 }
   0xd   : > { %s41_s14 = sadd.s32 1, %s1926_s27  ;;  %p193_p1 = scmp.ne.s32.totalorder %s1910_s23, %s1906_s22 }
   0xe   : > { %p194_p2 = scmp.eq.s32.totalorder %s1638_s29, 3  ;;  %s2294_s13 = smov (%p39_p0, %s38_s13), 0 }
   0xf   : > { %2274 = sst [smem:[#allocation12_spill]] %s2294_s13  ;;  %s2296_s14 = smov (!%p39_p0, %s41_s14), %s1926_s27 }
  0x10   : > { %s179_s15 = ssub.s32 %s1922_s26, %s2294_s13  ;;  %p2052_p3 = por %p194_p2, %p193_p1 }
  0x11   : > { %p43_p4 = scmp.ge.s32.totalorder %s2296_s14, 2  ;;  %p199_p5 = scmp.ne.s32.totalorder %s1906_s22, %s1902_s21 }
  0x12   : > { %p200_p6 = scmp.eq.s32.totalorder %s1639_s30, 3  ;;  %p1642_p7 = scmp.ge.s32.totalorder %s1930_s28, 1 }
  0x13   : > { %s2298_s14 = smov (%p43_p4, %s2296_s14), 0  ;;  %p459_p9 = scmp.lt.s32.totalorder %s1930_s28, 5 }
  0x14   : > { %2276 = sst [smem:[#allocation13_spill]] %s2298_s14  ;;  %p2061_p8 = por %p200_p6, %p199_p5 }
  0x15   : > { %s178_s18 = ssub.s32 %s1926_s27, %s2298_s14  ;;  %s183_s19 = sadd.s32 1, %s1910_s23 }
  0x16   : > { %s2277_s17 = scalar_select %p2061_p8, 1, 0 }
  0x17   : > { %s180_s20 = sor.u32 %s179_s15, %s178_s18  ;;  %p460_p10 = pnand %p1642_p7, %p459_p9 }
  0x18   : > { %2278 = sst [smem:[#allocation14_spill]] %s2277_s17  ;;  %p181_p11 = scmp.eq.s32.totalorder %s180_s20, 0  ;;  %v661_v1 = vlaneseq (!%p460_p10)  ;;  %v1932_v2 = vmov (!%p460_p10), 0.0   ;;  %vm679_vm0 = vcmask (!%p460_p10), 23552   ;;  %vm1933_vm1 = vmmov (!%p460_p10), 0  }
  0x19   : > { %463 = sbr.rel (%p460_p10) target bundleno = 291 (0x123), region = 40  ;;  %p579_p12 = scmp.lt.s32.totalorder (!%p460_p10), %s1918_s25, 1  ;;  %1687 = vmatprep.subr.mxu1 (!%p460_p10), %v1932_v2  ;;  %1702 = vmatprep.subr.mxu0 (!%p460_p10), %v1932_v2  ;;  %vm683_vm2 = vcmask (!%p460_p10), 1042432  }
  0x1a   : > { %s2070_s29 = scalar_select %p181_p11, %s1910_s23, %s183_s19  }
  0x1b   : > { %p581_p13 = scmp.lt.s32.totalorder (!%p460_p10), %s1914_s24, 1  ;;  %s2280_s0 = sld [smem:[#allocation16_spill]] (!%p460_p10)  ;;  %1689 = vmatprep.mubr.msk.f32.mxu1 (!%p460_p10), %vm1933_vm1, %v1932_v2  ;;  %1704 = vmatprep.mubr.msk.f32.mxu0 (!%p460_p10), %vm1933_vm1, %v1932_v2  ;;  %v662_v5 = vshrl.u32 (!%p460_p10), %v661_v1, 7 }
  0x1c   : > { %2279 = sst [smem:[#allocation15_spill]] %s2070_s29  ;;  %s2126_s21 = sand.u32 (!%p460_p10), 1, %s1906_s22  }
  0x1d   : > { %s1669_s26 = sshll.u32 (!%p460_p10), %s1918_s25, 1 }
  0x1e   : > { %s2130_s27 = sadd.s32 (!%p460_p10), %s1914_s24, %s1669_s26 }
  0x1f   : > { %s2267_s17 = sshll.u32 (!%p460_p10), %s2130_s27, 7 }
  0x20   : > { %s580_s15 = scalar_select %p579_p12, %s1918_s25, 1 }
  0x21   : > { %v678_v0 = vld [vmem:[%s2280_s0] sm:$0xff]  ;;  %s582_s18 = scalar_select %p581_p13, %s1914_s24, 1 }
  0x22   : > { %v681_v3 = vsel %vm679_vm0, %v678_v0, 0  ;;  %s1645_s13 = sshll.u32 %s580_s15, 1  ;;  %s2141_s15 = scalar_lea.hbm %s2253_s6, %s2267_s17 }
  0x23   : > { %v753_v4 = vand.u32 4294901760, %v681_v3  ;;  %s584_s19 = sadd.s32 %s1645_s13, %s582_s18  ;;  %s1934_s24 = smov [#allocation4]  }
  0x24   : > { %s2085_s20 = sshll.u32 %s584_s19, 2  ;;  %s601_s14 = scalar_lea.vmem %s2250_s3, %s584_s19 }
  0x25   : > { %v754_v6 = vsub.f32 %v681_v3, %v753_v4  ;;  %s594_s29 = scalar_lea.vmem %s2249_s2, %s2085_s20  ;;  %v1663_v8 = vld [vmem:[%s601_s14] ss:$0 sm:$0xff]  ;;  %s2094_s23 = sshll.u32 %s584_s19, 3 }
  0x26   : > { %v658_v9 = vld [vmem:[%s594_s29] sm:$0x7]  ;;  %vm667_vm3 = vcmp.eq.s32.totalorder %v662_v5, %v1663_v8  ;;  %s586_s13 = scalar_lea.vmem %s2248_s1, %s2094_s23  ;;  %s608_s0 = scalar_lea.vmem %s2251_s4, %s584_s19 }
  0x27   : > { %v755_v7 = vand.u32 4294901760, %v754_v6  ;;  %v685_v10 = vsel %vm683_vm2, %v658_v9, 0  ;;  %v1664_v12 = vsel %vm667_vm3, 1.0, %v1932_v2  ;;  %v2105_v13 = vld [vmem:[%s586_s13] sm:$0xff]  ;;  %v1152_v26 = vsel %vm683_vm2, %v658_v9, 0.0  ;;  %s2268_s14 = sshll.u32 %s2126_s21, 3 }
  0x28   : > { %v1665_v14 = vld [vmem:[%s608_s0] ss:$0 sm:$0xff]  ;;  %v688_v15 = vand.u32 4294901760, %v685_v10  ;;  %1143 = vadd.xlane.f32.xlu1 %v1664_v12  ;;  %1140 = vadd.xlane.f32.xlu0 %v2105_v13  ;;  %v1135_v20 = vmul.f32 %v1664_v12, %v2105_v13  ;;  %s518_s29 = scalar_lea.vmem [#allocation4], %s2268_s14  ;;  %s1166_s13 = scalar_lea.sflag [#allocation5], %s2126_s21 }
  0x29   : > { %v756_v11 = vsub.f32 %v754_v6, %v755_v7  ;;  %vm675_vm4 = vcmp.eq.s32.totalorder %v662_v5, %v1665_v14  ;;  %670 = vst [vmem:[%s518_s29] sm:$0xff] %v1664_v12  ;;  %s1244_s18 = sshll.u32 %s518_s29, 4  ;;  %s1808_s25 = sshll.u32 %s1934_s24, 4  ;;  %s1245_s18 = int_to_ptr.vmem [resolvable:$true] %s1244_s18  ;;  %s1809_s25 = int_to_ptr.vmem [resolvable:$false] %s1808_s25 }
  0x2a   : > { %v1666_v17 = vsel %vm675_vm4, 1.0, %v1932_v2  ;;  %1688 = vmatpush3.msra.mxu1 %v688_v15  ;;  %v765_v18 = vsub.f32 %v685_v10, %v688_v15  ;;  %1703 = vmatpush3.msra.mxu0 %v688_v15  ;;  %s1804_s0 = scalar_lea.vmem %s1245_s18, 128  ;;  %s1810_s26 = scalar_lea.vmem %s1809_s25, 256 }
  0x2b   : > { %v757_v16 = vand.u32 4294901760, %v756_v11  ;;  %v1146_v19 = vmul.f32 %v1666_v17, %v658_v9  ;;  %1705 = vmatmul.mubr.f32.vlgmr.msra.gmra.mrb[0].mxu0 %v755_v7  ;;  %1692 = vmatprep.subr.mxu1 %v1932_v2  ;;  %v1156_v24 = vsel %vm683_vm2, %v1666_v17, 0.0  ;;  %p1805_p0 = scmp.ne.s32.totalorder %s1245_s18, %s1804_s0  ;;  %p1811_p4 = scmp.lt.s32.totalorder %s1245_s18, %s1809_s25 }
  0x2c   : > { %1707 = vmatprep.subr.mxu0 %v1932_v2  ;;  %v766_v21 = vand.u32 4294901760, %v765_v18  ;;  %1709 = vmatprep.mubr.msk.f32.mxu0 %vm1933_vm1, %v1932_v2  ;;  %p1812_p5 = scmp.lt.s32.totalorder %s1810_s26, %s1804_s0 }
  0x2d   : > { %1690 = vmatmul.mubr.f32.vlgmr.msra.gmra.mrb[0].mxu1 %v757_v16  ;;  %v1147_v22 = vsel %vm683_vm2, %v1146_v19, 0.0  ;;  %1136 = vadd.xlane.f32.xlu0 %v1135_v20  ;;  %p1806_p1 = pnand %p1805_p0, %p2052_p3 }
  0x2e   : > { %1694 = vmatprep.mubr.msk.f32.mxu1 %vm1933_vm1, %v1932_v2  ;;  %v767_v23 = vsub.f32 %v765_v18, %v766_v21  ;;  %1708 = vmatpush3.msra.mxu0 %v766_v21  ;;  %p1813_p6 = por %p1812_p5, %p1811_p4 }
  0x2f   : > { %1148 = vadd.xlane.f32.xlu1 %v1147_v22  ;;  %1712 = vmatprep.subr.mxu0 %v1932_v2  ;;  %p1807_p2 = pneg %p1806_p1 }
  0x30   : > { %v768_v25 = vand.u32 4294901760, %v767_v23 }
  0x31   : > { %1153 = vadd.xlane.f32.xlu0 %v1152_v26  ;;  %p1814_p7 = pnand %p1813_p6, %p1807_p2 }
  0x32   : > { %1693 = vmatpush3.msra.mxu1 %v768_v25 }
  0x33   : > { %1157 = vadd.xlane.f32.xlu1 %v1156_v24  ;;  %1710 = vmatmul.mubr.f32.vlgmr.msra.gmra.mrb[0].mxu0 %v753_v4 }
  0x34   : > { %1697 = vmatprep.subr.mxu1 %v1932_v2  ;;  %1713 = vmatpush3.msra.mxu0 %v688_v15 }
  0x35   : > { %1695 = vmatmul.mubr.f32.vlgmr.msra.gmra.mrb[0].mxu1 %v753_v4  ;;  %1714 = vmatprep.mubr.msk.f32.mxu0 %vm1933_vm1, %v1932_v2 }
  0x36   : > { %1699 = vmatprep.mubr.msk.f32.mxu1 %vm1933_vm1, %v1932_v2  ;;  %1698 = vmatpush3.msra.mxu1 %v765_v18 }
  0x3b   : > { %1715 = vmatmul.mubr.f32.vlgmr.msra.gmra.mrb[0].mxu0 %v753_v4 }
  0x3d   : > { %1700 = vmatmul.mubr.f32.vlgmr.msra.gmra.mrb[0].mxu1 %v754_v6 }
  0x3e   : > { %1817 = shalt.err (!%p1814_p7)
}
  0x3f   : > { %s1818_s29 = scalar_lea.hbm %s2141_s15, 128  ;;  %s1822_s24 = scalar_lea.hbm %s2253_s6, 512 }
  0x40   : > { %p1819_p9 = scmp.ne.s32.totalorder %s2141_s15, %s1818_s29  ;;  %p1823_p12 = scmp.lt.u32.totalorder %s2141_s15, %s2253_s6 }
  0x41   : > { %p1824_p13 = scmp.lt.u32.totalorder %s1822_s24, %s1818_s29  ;;  %p1826_p1 = scmp.lt.u32.totalorder %s1818_s29, %s2141_s15 }
  0x42   : > { %p1820_p10 = pnand %p1819_p9, %p2052_p3 }
  0x43   : > { %p1825_p0 = por %p1824_p13, %p1823_p12 }
  0x44   : > { %p1821_p11 = pneg %p1820_p10 }
  0x45   : > { %p1827_p2 = por %p1826_p1, %p1825_p0 }
  0x47   : > { %p1828_p4 = pnand %p1827_p2, %p1821_p11 }
  0x49   : > { %1831 = shalt.err (!%p1828_p4)
}
  0x4a   : > { %1727 = dma.vmem_to_hbm [thread:$0]  (%p2052_p3), %s1245_s18, 128, %s2141_s15, %s1166_s13   ;;  %vm1138_vm5 = vcmask 7168   ;;  %vm1150_vm6 = vcmask 2048  }
  0x4b   : > { %s632_s17 = scalar_lea.vmem %s2256_s9, %s2094_s23  ;;  %s624_s29 = scalar_lea.vmem %s2255_s8, %s2094_s23 }
  0x4c   : > { %s640_s14 = scalar_lea.vmem %s2257_s10, %s2085_s20  ;;  %s616_s13 = scalar_lea.vmem %s2254_s7, %s2094_s23 }
  0x4d   : > { %s2281_s23 = sshll.u32 %s2126_s21, 3  ;;  %s2282_s25 = sshll.u32 %s2130_s27, 7 }
  0x4e   : > { %s1935_s26 = smov [#allocation2]  }
  0xb5   : > { %v1144_v27 = vpop.xlane.xlu1 %1143  ;;  %v1141_v28 = vpop.xlane.xlu0 %1140 }
  0xb6   : > { %1145 = vst.msk [vmem:[%s632_s17] sm:$0xff] %vm1138_vm5, %v1144_v27  ;;  %1142 = vst.msk [vmem:[%s624_s29] sm:$0xff] %vm1138_vm5, %v1141_v28  ;;  %s656_s17 = scalar_lea.vmem %s2259_s12, %s2085_s20  ;;  %s648_s29 = scalar_lea.vmem %s2258_s11, %s2085_s20 }
  0xb7   : > { %s1161_s20 = scalar_lea.sflag [#allocation3], %s2126_s21 }
  0xba   : > { %v1137_v30 = vpop.xlane.xlu0 %1136 }
  0xbb   : > { %1139 = vst.msk [vmem:[%s616_s13] sm:$0xff] %vm1138_vm5, %v1137_v30  ;;  %s2193_s13 = scalar_lea.hbm %s2252_s5, %s2282_s25 }
  0xbc   : > { %v1149_v29 = vpop.xlane.xlu1 %1148 }
  0xbd   : > { %1151 = vst.msk [vmem:[%s640_s14] sm:$0x7] %vm1150_vm6, %v1149_v29  ;;  %s511_s14 = scalar_lea.vmem [#allocation2], %s2281_s23 }
  0xbe   : > { %v1154_v32 = vpop.xlane.xlu0 %1153  ;;  %s1229_s24 = sshll.u32 %s511_s14, 4  ;;  %s2195_s24 = int_to_ptr.vmem [resolvable:$true] %s1229_s24 }
  0xbf   : > { %1155 = vst.msk [vmem:[%s648_s29] sm:$0x7] %vm1150_vm6, %v1154_v32  ;;  %s1832_s0 = scalar_lea.vmem %s2195_s24, 128 }
  0xc0   : > { %v1158_v31 = vpop.xlane.xlu1 %1157  ;;  %p1833_p5 = scmp.ne.s32.totalorder %s2195_s24, %s1832_s0 }
  0xc1   : > { %1159 = vst.msk [vmem:[%s656_s17] sm:$0x7] %vm1150_vm6, %v1158_v31  ;;  %s1836_s17 = sshll.u32 %s1935_s26, 4  ;;  %s1837_s17 = int_to_ptr.vmem [resolvable:$false] %s1836_s17 }
  0xc2   : > { %p1834_p6 = pnand %p1833_p5, %p2052_p3  ;;  %s1838_s27 = scalar_lea.vmem %s1837_s17, 256 }
  0xc3   : > { %p1839_p9 = scmp.lt.s32.totalorder %s2195_s24, %s1837_s17  ;;  %p1840_p10 = scmp.lt.s32.totalorder %s1838_s27, %s1832_s0 }
  0xc4   : > { %p1835_p7 = pneg %p1834_p6 }
  0xc5   : > { %p1841_p11 = por %p1840_p10, %p1839_p9 }
  0xc7   : > { %p1842_p12 = pnand %p1841_p11, %p1835_p7 }
 0x10e   : > { %v1129_v34 = vpop.f32.mrb[0].mxu0 }
 0x10f   : > { %v1716_v37 = vpop.f32.mrb[1].mxu0 }
 0x110   : > { %v909_v33 = vpop.f32.mrb[0].mxu1 }
 0x111   : > { %v1717_v35 = vadd.f32 %v1129_v34, %v909_v33  ;;  %v1701_v36 = vpop.f32.mrb[1].mxu1 }
 0x113   : > { %v1133_v38 = vmul.f32 %v1717_v35, %v2105_v13 }
 0x115   : > { %1134 = vst [vmem:[%s511_s14] sm:$0xff] %v1133_v38 }
 0x116   : > { %1845 = shalt.err (!%p1842_p12)
}
 0x117   : > { %s1846_s21 = scalar_lea.hbm %s2193_s13, 128  ;;  %s1850_s29 = scalar_lea.hbm %s2252_s5, 512 }
 0x118   : > { %p1847_p13 = scmp.ne.s32.totalorder %s2193_s13, %s1846_s21  ;;  %p1851_p2 = scmp.lt.u32.totalorder %s2193_s13, %s2252_s5 }
 0x119   : > { %p1852_p4 = scmp.lt.u32.totalorder %s1850_s29, %s1846_s21  ;;  %p1854_p6 = scmp.lt.u32.totalorder %s1846_s21, %s2193_s13 }
 0x11a   : > { %p1848_p0 = pnand %p1847_p13, %p2052_p3 }
 0x11b   : > { %p1853_p5 = por %p1852_p4, %p1851_p2 }
 0x11c   : > { %p1849_p1 = pneg %p1848_p0 }
 0x11d   : > { %p1855_p7 = por %p1854_p6, %p1853_p5 }
 0x11f   : > { %p1856_p9 = pnand %p1855_p7, %p1849_p1 }
 0x121   : > { %1859 = shalt.err (!%p1856_p9)
}
 0x122   : > { %1726 = dma.vmem_to_hbm [thread:$0]  (%p2052_p3), %s2195_s24, 128, %s2193_s13, %s1161_s20  }
 0x123 PF: > { %s2283_s25 = sld [smem:[#allocation8_spill]]  ;;  %p1737_p10 = scmp.ge.s32.totalorder %s1930_s28, 2 }
 0x125   : > { %p1731_p11 = pnand %p1737_p10, %p2061_p8 }
 0x129   : > { %s1274_s18 = sand.u32 1, %s2283_s25  }
 0x12a   : > { %s1275_s0 = scalar_lea.sflag [#allocation3], %s1274_s18 }
 0x12b   : > { %1893 = dma.done.wait (!%p1731_p11), %s1275_s0, 128  }
 0x12c   : > { %1895 = vsyncadd (!%p1731_p11), %s1275_s0, 4294967168  ;;  %s1284_s26 = scalar_lea.sflag [#allocation5], %s1274_s18 }
 0x12d   : > { %1897 = dma.done.wait (!%p1731_p11), %s1284_s26, 128  }
 0x12e   : > { %1899 = vsyncadd (!%p1731_p11), %s1284_s26, 4294967168  ;;  %s29_s28 = sadd.s32 1, %s1930_s28   ;;  %s2285_s16 = sld [smem:[#allocation9_spill]] }
 0x12f   : > { %p26_p12 = scmp.ge.s32.totalorder %s29_s28, 6   ;;  %s2286_s23 = sld [smem:[#allocation15_spill]] }
 0x130   : > { %s2287_s24 = sld [smem:[#allocation10_spill]]  ;;  %s2288_s25 = sld [smem:[#allocation11_spill]] }
 0x131   : > { %s2289_s26 = sld [smem:[#allocation12_spill]]  ;;  %s2290_s27 = sld [smem:[#allocation13_spill]] }
 0x132   : > { %s2291_s21 = smov %s1906_s22  ;;  %28 = sbr.rel (!%p26_p12) target bundleno = 9 (0x9), region = 173 }
 0x134   : > { %s2292_s22 = smov %s2285_s16 }
 0x139   :  { %1355 = vsyncpa [#allocation3], 1 }
 0x13a   :  { %1357 = vsyncpa [#allocation3 + $0x1], 1 }
 0x13b   :  { %1358 = vsyncpa [#allocation5], 1 }
 0x13c   :  { %1360 = vsyncpa [#allocation5 + $0x1], 1 }

</bundles_post_ra>
